<compile_context>
chip_gen: v6e
topology: v6e:2x2x1
jax: 0.10.0
libtpu: 0.0.40
codegen_flags: <defaults>
</compile_context>

<pallas_src>
import functools

import jax
import jax.numpy as jnp
from jax.experimental import pallas as pl
from jax.experimental.pallas import tpu as pltpu


def _round_up(x, m):
    return ((x + m - 1) // m) * m


def actor_kernel(x_ref, w1_ref, b1_ref, w2_ref, b2_ref, w3_ref, b3_ref,
                 o_ref, *, max_a):
    # x_ref: [TB, state_dim] bf16 ; weights bf16 ; biases f32 [1, D] ; out f32.
    x = x_ref[...]                                                   # bf16

    # fc1 + relu  (MXU bf16 operands, f32 accumulate; VPU work stays f32)
    h1 = jnp.dot(x, w1_ref[...], preferred_element_type=jnp.float32)
    h1 = jnp.maximum(h1 + b1_ref[...], 0.0)

    # fc2 + relu  (hidden dim lane-padded to 128; padded cols are exactly 0)
    h2 = jnp.dot(h1.astype(jnp.bfloat16), w2_ref[...],
                 preferred_element_type=jnp.float32)
    h2 = jnp.maximum(h2 + b2_ref[...], 0.0)

    # fc3 + tanh * max_a  (output lane-padded to 128 -> lane-dense store)
    h3 = jnp.dot(h2.astype(jnp.bfloat16), w3_ref[...],
                 preferred_element_type=jnp.float32)
    h3 = h3 + b3_ref[...]
    o_ref[...] = (jnp.tanh(h3) * max_a).astype(o_ref.dtype)


def actor_forward(state, params, max_a):
    """state: [B, state_dim] float32.  Returns [B, act_dim] float32."""
    w1, b1, w2, b2, w3, b3 = params          # weights stored as [in, out], f32
    B, state_dim = state.shape
    h1_dim = w1.shape[1]                     # 128 (already lane-aligned)
    h2_dim = w2.shape[1]                     # 64
    act_dim = w3.shape[1]

    h2_pad = _round_up(h2_dim, 128)          # 128
    out_pad = _round_up(act_dim, 128)        # 128

    # --- zero-pad narrow dims to lane width (exact math: padded cols are 0) ---
    w2p = jnp.zeros((h1_dim, h2_pad), jnp.float32).at[:, :h2_dim].set(w2)
    b2p = jnp.zeros((1, h2_pad), jnp.float32).at[0, :h2_dim].set(b2)
    w3p = jnp.zeros((h2_pad, out_pad), jnp.float32).at[:h2_dim, :act_dim].set(w3)
    b3p = jnp.zeros((1, out_pad), jnp.float32).at[0, :act_dim].set(b3)
    b1_2d = b1.reshape(1, h1_dim)

    # bf16 MXU operands; biases stay f32.
    w1b = w1.astype(jnp.bfloat16)
    w2b = w2p.astype(jnp.bfloat16)
    w3b = w3p.astype(jnp.bfloat16)

    # --- batch tiling: stream (TB, *) blocks of state/out, weights resident ---
    if B <= 512:
        tb = _round_up(B, 8)
        b_pad = tb
    else:
        tb = 512
        b_pad = _round_up(B, tb)
    x_b = jnp.zeros((b_pad, state_dim), jnp.bfloat16).at[:B].set(
        state.astype(jnp.bfloat16))

    grid = (pl.cdiv(b_pad, tb),)
    resident = lambda shape: pl.BlockSpec(shape, lambda i: (0, 0))

    flops = 2 * b_pad * (state_dim * h1_dim + h1_dim * h2_pad + h2_pad * out_pad)
    bytes_accessed = (x_b.size * 2 + w1b.size * 2 + w2b.size * 2 + w3b.size * 2
                      + (b1_2d.size + b2p.size + b3p.size) * 4
                      + b_pad * out_pad * 4)
    cost = pl.CostEstimate(flops=flops,
                           transcendentals=b_pad * out_pad,
                           bytes_accessed=bytes_accessed)

    out_padded = pl.pallas_call(
        functools.partial(actor_kernel, max_a=float(max_a)),
        out_shape=jax.ShapeDtypeStruct((b_pad, out_pad), jnp.float32),
        grid=grid,
        in_specs=[
            pl.BlockSpec((tb, state_dim), lambda i: (i, 0)),   # streamed
            resident(w1b.shape), resident(b1_2d.shape),        # resident weights
            resident(w2b.shape), resident(b2p.shape),
            resident(w3b.shape), resident(b3p.shape),
        ],
        out_specs=pl.BlockSpec((tb, out_pad), lambda i: (i, 0)),
        compiler_params=pltpu.CompilerParams(
            dimension_semantics=("parallel",)),                # 2 TCs on v7x
        cost_estimate=cost,
    )(x_b, w1b, b1_2d, w2b, b2p, w3b, b3p)

    return out_padded[:B, :act_dim]


def init_actor_params(key, state_dim, act_dim):
    """Deterministic init mirroring the PyTorch module: weights ~ N(0, 0.1),
    biases ~ U(-1/sqrt(fan_in), 1/sqrt(fan_in)) (PyTorch Linear default)."""
    ks = jax.random.split(key, 6)

    def linear(kw, kb, fan_in, fan_out):
        # stored as [in, out] (transpose of PyTorch's [out, in]) for x @ W
        w = 0.1 * jax.random.normal(kw, (fan_in, fan_out), dtype=jnp.float32)
        bound = 1.0 / jnp.sqrt(jnp.float32(fan_in))
        b = jax.random.uniform(kb, (fan_out,), minval=-bound, maxval=bound,
                               dtype=jnp.float32)
        return w, b

    w1, b1 = linear(ks[0], ks[1], state_dim, 128)
    w2, b2 = linear(ks[2], ks[3], 128, 64)
    w3, b3 = linear(ks[4], ks[5], 64, act_dim)
    return (w1, b1, w2, b2, w3, b3)


if __name__ == "__main__":
    key = jax.random.PRNGKey(0)
    k_param, k_state = jax.random.split(key)

    B, state_dim, act_dim = 8, 16, 4
    max_a = 2.0

    params = init_actor_params(k_param, state_dim, act_dim)
    state = jax.random.normal(k_state, (B, state_dim), dtype=jnp.float32)

    out = actor_forward(state, params, max_a)
    out = jax.block_until_ready(out)
    assert out.shape == (B, act_dim)

    # Reference mirroring the kernel's mixed precision (bf16 matmul operands,
    # f32 accumulation / activations) -> tight tolerance.
    w1, b1, w2, b2, w3, b3 = params
    h = jnp.maximum(
        jnp.dot(state.astype(jnp.bfloat16), w1.astype(jnp.bfloat16),
                preferred_element_type=jnp.float32) + b1, 0.0)
    h = jnp.maximum(
        jnp.dot(h.astype(jnp.bfloat16), w2.astype(jnp.bfloat16),
                preferred_element_type=jnp.float32) + b2, 0.0)
    ref_mixed = jnp.tanh(
        jnp.dot(h.astype(jnp.bfloat16), w3.astype(jnp.bfloat16),
                preferred_element_type=jnp.float32) + b3) * max_a
    assert jnp.allclose(out, ref_mixed, atol=2e-3, rtol=2e-3), \
        "mismatch vs mixed-precision reference"

    # Sanity check against the full-f32 reference (loose, bf16 rounding only).
    hf = jnp.maximum(state @ w1 + b1, 0.0)
    hf = jnp.maximum(hf @ w2 + b2, 0.0)
    ref_f32 = jnp.tanh(hf @ w3 + b3) * max_a
    assert jnp.allclose(out, ref_f32, atol=5e-2, rtol=5e-2), \
        "mismatch vs f32 reference"

    print("KERNEL_OK")
</pallas_src>

<mosaic_0001>
module attributes {stable_mosaic.version = 11 : i64} {
  func.func @actor_kernel(%arg0: i32, %arg1: memref<8x16xbf16, #tpu.memory_space<vmem>>, %arg2: memref<16x128xbf16, #tpu.memory_space<vmem>>, %arg3: memref<1x128xf32, #tpu.memory_space<vmem>>, %arg4: memref<128x128xbf16, #tpu.memory_space<vmem>>, %arg5: memref<1x128xf32, #tpu.memory_space<vmem>>, %arg6: memref<128x128xbf16, #tpu.memory_space<vmem>>, %arg7: memref<1x128xf32, #tpu.memory_space<vmem>>, %arg8: memref<8x128xf32, #tpu.memory_space<vmem>>) attributes {dimension_semantics = [#tpu.dimension_semantics<parallel>], iteration_bounds = array<i64: 1>, scalar_prefetch = 0 : i64, scratch_operands = 0 : i64, tpu.core_type = #tpu.core_type<tc>, window_params = [{transform_indices = @transform_0, window_bounds = array<i64: 8, 16>}, {pipeline_mode = #tpu.pipeline_mode<synchronous>, transform_indices = @transform_1, window_bounds = array<i64: 16, 128>}, {pipeline_mode = #tpu.pipeline_mode<synchronous>, transform_indices = @transform_2, window_bounds = array<i64: 1, 128>}, {pipeline_mode = #tpu.pipeline_mode<synchronous>, transform_indices = @transform_3, window_bounds = array<i64: 128, 128>}, {pipeline_mode = #tpu.pipeline_mode<synchronous>, transform_indices = @transform_4, window_bounds = array<i64: 1, 128>}, {pipeline_mode = #tpu.pipeline_mode<synchronous>, transform_indices = @transform_5, window_bounds = array<i64: 128, 128>}, {pipeline_mode = #tpu.pipeline_mode<synchronous>, transform_indices = @transform_6, window_bounds = array<i64: 1, 128>}, {transform_indices = @transform_7, window_bounds = array<i64: 8, 128>}]} {
    %c0 = arith.constant 0 : index
    %c0_0 = arith.constant 0 : index
    %0 = vector.load %arg1[%c0, %c0_0] : memref<8x16xbf16, #tpu.memory_space<vmem>>, vector<8x16xbf16>
    %c0_1 = arith.constant 0 : index
    %c0_2 = arith.constant 0 : index
    %1 = vector.load %arg2[%c0_1, %c0_2] : memref<16x128xbf16, #tpu.memory_space<vmem>>, vector<16x128xbf16>
    %cst = arith.constant dense<0.000000e+00> : vector<8x128xf32>
    %2 = tpu.matmul %0, %1, %cst {dimension_numbers = #tpu.dot_dimension_numbers<[1], [0], [0], [1], [0, 0, 1, 1], [], []>} : vector<8x16xbf16>, vector<16x128xbf16>, vector<8x128xf32> -> vector<8x128xf32>
    %c0_3 = arith.constant 0 : index
    %c0_4 = arith.constant 0 : index
    %3 = vector.load %arg3[%c0_3, %c0_4] : memref<1x128xf32, #tpu.memory_space<vmem>>, vector<1x128xf32>
    %4 = vector.broadcast %3 : vector<1x128xf32> to vector<8x128xf32>
    %5 = arith.addf %2, %4 : vector<8x128xf32>
    %cst_5 = arith.constant 0.000000e+00 : f32
    %6 = vector.broadcast %cst_5 : f32 to vector<8x128xf32>
    %7 = arith.maximumf %5, %6 : vector<8x128xf32>
    %8 = arith.truncf %7 : vector<8x128xf32> to vector<8x128xbf16>
    %c0_6 = arith.constant 0 : index
    %c0_7 = arith.constant 0 : index
    %9 = vector.load %arg4[%c0_6, %c0_7] : memref<128x128xbf16, #tpu.memory_space<vmem>>, vector<128x128xbf16>
    %cst_8 = arith.constant dense<0.000000e+00> : vector<8x128xf32>
    %10 = tpu.matmul %8, %9, %cst_8 {dimension_numbers = #tpu.dot_dimension_numbers<[1], [0], [0], [1], [0, 0, 1, 1], [], []>} : vector<8x128xbf16>, vector<128x128xbf16>, vector<8x128xf32> -> vector<8x128xf32>
    %c0_9 = arith.constant 0 : index
    %c0_10 = arith.constant 0 : index
    %11 = vector.load %arg5[%c0_9, %c0_10] : memref<1x128xf32, #tpu.memory_space<vmem>>, vector<1x128xf32>
    %12 = vector.broadcast %11 : vector<1x128xf32> to vector<8x128xf32>
    %13 = arith.addf %10, %12 : vector<8x128xf32>
    %cst_11 = arith.constant 0.000000e+00 : f32
    %14 = vector.broadcast %cst_11 : f32 to vector<8x128xf32>
    %15 = arith.maximumf %13, %14 : vector<8x128xf32>
    %16 = arith.truncf %15 : vector<8x128xf32> to vector<8x128xbf16>
    %c0_12 = arith.constant 0 : index
    %c0_13 = arith.constant 0 : index
    %17 = vector.load %arg6[%c0_12, %c0_13] : memref<128x128xbf16, #tpu.memory_space<vmem>>, vector<128x128xbf16>
    %cst_14 = arith.constant dense<0.000000e+00> : vector<8x128xf32>
    %18 = tpu.matmul %16, %17, %cst_14 {dimension_numbers = #tpu.dot_dimension_numbers<[1], [0], [0], [1], [0, 0, 1, 1], [], []>} : vector<8x128xbf16>, vector<128x128xbf16>, vector<8x128xf32> -> vector<8x128xf32>
    %c0_15 = arith.constant 0 : index
    %c0_16 = arith.constant 0 : index
    %19 = vector.load %arg7[%c0_15, %c0_16] : memref<1x128xf32, #tpu.memory_space<vmem>>, vector<1x128xf32>
    %20 = vector.broadcast %19 : vector<1x128xf32> to vector<8x128xf32>
    %21 = arith.addf %18, %20 : vector<8x128xf32>
    %22 = math.tanh %21 : vector<8x128xf32>
    %cst_17 = arith.constant 2.000000e+00 : f32
    %23 = vector.broadcast %cst_17 : f32 to vector<8x128xf32>
    %24 = arith.mulf %22, %23 : vector<8x128xf32>
    %c0_18 = arith.constant 0 : index
    %c0_19 = arith.constant 0 : index
    %25 = vector.load %arg8[%c0_18, %c0_19] : memref<8x128xf32, #tpu.memory_space<vmem>>, vector<8x128xf32>
    tpu.vector_store %arg8[%c0_18, %c0_19], %24 {strides = array<i32>} : memref<8x128xf32, #tpu.memory_space<vmem>>, vector<8x128xf32>,
    return
  }
  func.func @transform_0(%arg0: i32) -> (i32, i32) {
    %c0_i32 = arith.constant 0 : i32
    %c0_i32_0 = arith.constant 0 : i32
    return %arg0, %c0_i32 : i32, i32
  }
  func.func @transform_1(%arg0: i32) -> (i32, i32) {
    %c0_i32 = arith.constant 0 : i32
    %c0_i32_0 = arith.constant 0 : i32
    %c0_i32_1 = arith.constant 0 : i32
    return %c0_i32, %c0_i32_0 : i32, i32
  }
  func.func @transform_2(%arg0: i32) -> (i32, i32) {
    %c0_i32 = arith.constant 0 : i32
    %c0_i32_0 = arith.constant 0 : i32
    %c0_i32_1 = arith.constant 0 : i32
    return %c0_i32, %c0_i32_0 : i32, i32
  }
  func.func @transform_3(%arg0: i32) -> (i32, i32) {
    %c0_i32 = arith.constant 0 : i32
    %c0_i32_0 = arith.constant 0 : i32
    %c0_i32_1 = arith.constant 0 : i32
    return %c0_i32, %c0_i32_0 : i32, i32
  }
  func.func @transform_4(%arg0: i32) -> (i32, i32) {
    %c0_i32 = arith.constant 0 : i32
    %c0_i32_0 = arith.constant 0 : i32
    %c0_i32_1 = arith.constant 0 : i32
    return %c0_i32, %c0_i32_0 : i32, i32
  }
  func.func @transform_5(%arg0: i32) -> (i32, i32) {
    %c0_i32 = arith.constant 0 : i32
    %c0_i32_0 = arith.constant 0 : i32
    %c0_i32_1 = arith.constant 0 : i32
    return %c0_i32, %c0_i32_0 : i32, i32
  }
  func.func @transform_6(%arg0: i32) -> (i32, i32) {
    %c0_i32 = arith.constant 0 : i32
    %c0_i32_0 = arith.constant 0 : i32
    %c0_i32_1 = arith.constant 0 : i32
    return %c0_i32, %c0_i32_0 : i32, i32
  }
  func.func @transform_7(%arg0: i32) -> (i32, i32) {
    %c0_i32 = arith.constant 0 : i32
    %c0_i32_0 = arith.constant 0 : i32
    return %arg0, %c0_i32 : i32, i32
  }
}

</mosaic_0001>

<bundles_post_ra>
// kernel: tpu_custom_call.1
= control target key start
LH: loop header
LB: loop body
LE: loop exit
PB: predicated region body
PF: predicated region fallthrough
CT: control target
= control target key end

     0   :  { %12 = vsyncpa [#allocation3], 0  ;;  %s712_s0 = inlined_call_operand.hbm [shape: bf16[8,16], index: 0, kind: input, shape index: {}]   ;;  %s713_s1 = inlined_call_operand.hbm [shape: bf16[16,128], index: 1, kind: input, shape index: {}]   ;;  %s714_s2 = inlined_call_operand.vmem [shape: f32[1,128], index: 2, kind: input, shape index: {}]   ;;  %s715_s3 = inlined_call_operand.hbm [shape: bf16[128,128], index: 3, kind: input, shape index: {}]   ;;  %s716_s4 = inlined_call_operand.vmem [shape: f32[1,128], index: 4, kind: input, shape index: {}]   ;;  %s717_s5 = inlined_call_operand.hbm [shape: bf16[128,128], index: 5, kind: input, shape index: {}]   ;;  %s718_s6 = inlined_call_operand.vmem [shape: f32[1,128], index: 6, kind: input, shape index: {}]   ;;  %s719_s7 = inlined_call_operand.hbm [shape: f32[8,128], index: 7, kind: output, shape index: {}]  }
   0x1   :  { %13 = vsyncpa [#allocation6], 0 }
   0x2   :  { %14 = vsyncpa [#allocation9], 0 }
   0x3   :  { %15 = vsyncpa [#allocation4], 0  ;;  %s610_s24 = smov [#allocation5]  }
   0x4   :  { %s31_s25 = sshll.u32 %s610_s24, 4  ;;  %s32_s25 = int_to_ptr.vmem [resolvable:$true] %s31_s25 }
   0x5   :  { %s510_s26 = scalar_lea.vmem %s32_s25, 128  ;;  %p515_p1 = scmp.lt.s32.totalorder %s32_s25, %s32_s25 }
   0x6   :  { %p511_p0 = scmp.ne.s32.totalorder %s32_s25, %s510_s26  ;;  %p516_p2 = scmp.lt.s32.totalorder %s510_s26, %s510_s26 }
   0x8   :  { %p517_p3 = por %p516_p2, %p515_p1 }
   0xa   :  { %p518_p4 = pnand %p517_p3, %p511_p0 }
   0xc   :  { %521 = shalt.err (!%p518_p4)
}
   0xd   :  { %s611_s27 = smov 64   ;;  %s612_s28 = smov 4  }
   0xe   :  { %37 = dma.hbm_to_vmem [thread:$0]  %s713_s1, 128, %s32_s25, [#allocation6], %s611_s27, %s611_s27, %s612_s28  }
   0xf   :  { %s613_s8 = smov [#allocation2]   ;;  %s614_s10 = smov [#allocation7]  }
  0x10   :  { %s22_s9 = sshll.u32 %s613_s8, 4  ;;  %s45_s11 = sshll.u32 %s614_s10, 4  ;;  %s23_s9 = int_to_ptr.vmem [resolvable:$true] %s22_s9  ;;  %s46_s11 = int_to_ptr.vmem [resolvable:$true] %s45_s11 }
  0x11   :  { %s530_s12 = scalar_lea.vmem %s23_s9, 64  ;;  %p535_p6 = scmp.lt.s32.totalorder %s23_s9, %s23_s9 }
  0x12   :  { %p531_p5 = scmp.ne.s32.totalorder %s23_s9, %s530_s12  ;;  %p536_p7 = scmp.lt.s32.totalorder %s530_s12, %s530_s12 }
  0x14   :  { %p537_p8 = por %p536_p7, %p535_p6 }
  0x16   :  { %p538_p9 = pnand %p537_p8, %p531_p5 }
  0x18   :  { %541 = shalt.err (!%p538_p9)
}
  0x19   :  { %25 = dma.hbm_to_vmem [thread:$0]  %s712_s0, 64, %s23_s9, [#allocation3]  }
  0x1a   :  { %s550_s15 = scalar_lea.vmem %s46_s11, 1024  ;;  %p555_p11 = scmp.lt.s32.totalorder %s46_s11, %s46_s11 }
  0x1b   :  { %p551_p10 = scmp.ne.s32.totalorder %s46_s11, %s550_s15  ;;  %p556_p12 = scmp.lt.s32.totalorder %s550_s15, %s550_s15 }
  0x1d   :  { %p557_p13 = por %p556_p12, %p555_p11 }
  0x1f   :  { %p558_p0 = pnand %p557_p13, %p551_p10 }
  0x21   :  { %561 = shalt.err (!%p558_p0)
}
  0x22   :  { %51 = dma.hbm_to_vmem [thread:$0]  %s715_s3, 1024, %s46_s11, [#allocation6], %s611_s27, %s611_s27, %s612_s28  }
  0x23   :  { %s615_s17 = smov [#allocation8]  }
  0x24   :  { %s59_s18 = sshll.u32 %s615_s17, 4  ;;  %s60_s18 = int_to_ptr.vmem [resolvable:$true] %s59_s18 }
  0x25   :  { %s570_s19 = scalar_lea.vmem %s60_s18, 1024  ;;  %p575_p2 = scmp.lt.s32.totalorder %s60_s18, %s60_s18 }
  0x26   :  { %p571_p1 = scmp.ne.s32.totalorder %s60_s18, %s570_s19  ;;  %p576_p3 = scmp.lt.s32.totalorder %s570_s19, %s570_s19 }
  0x28   :  { %p577_p4 = por %p576_p3, %p575_p2 }
  0x2a   :  { %p578_p5 = pnand %p577_p4, %p571_p1 }
  0x2c   :  { %581 = shalt.err (!%p578_p5)
}
  0x2d   :  { %65 = dma.hbm_to_vmem [thread:$0]  %s717_s5, 1024, %s60_s18, [#allocation9], %s611_s27, %s611_s27, %s612_s28  }
  0x2e   :  { %602 = dma.done.wait [#allocation3], 64  }
  0x2f   :  { %603 = vsyncadd [#allocation3], 4294967232 }
  0x30   :  { %604 = dma.done.wait [#allocation6], 1152  }
  0x31   :  { %605 = vsyncadd [#allocation6], 4294966144 }
  0x32   :  { %606 = dma.done.wait [#allocation9], 1024  }
  0x33   :  { %607 = vsyncadd [#allocation9], 4294966272  ;;  %v616_v0 = vmov 0.0   ;;  %vm617_vm0 = vmmov 0   ;;  %v483_v1 = vld [vmem:[#allocation5] sm:$0xff]   ;;  %vm97_vm1 = vcmask 130048  }
  0x34   :  { %428 = vmatprep.subr.bf16.mxu0 %v616_v0  ;;  %430 = vmatprep.mubr.msk.bf16.mxu0 %vm617_vm0, %v616_v0  ;;  %v81_v2 = vld [vmem:[#allocation2] sm:$0xf]  ;;  %v484_v3 = vld [vmem:[#allocation7 + $0x38] sm:$0xff]   ;;  %v486_v5 = vld [vmem:[#allocation7 + $0x28] sm:$0xff]   ;;  %s618_s24 = smov [#allocation10]  }
  0x35   :  { %434 = vmatprep.subr.bf16.mxu1 %v616_v0  ;;  %450 = vmatprep.mubr.msk.bf16.mxu1 %vm617_vm0, %v616_v0  ;;  %v485_v4 = vld [vmem:[#allocation7 + $0x30] sm:$0xff]   ;;  %v487_v6 = vld [vmem:[#allocation7 + $0x20] sm:$0xff]   ;;  %v488_v7 = vld [vmem:[#allocation7 + $0x18] sm:$0xff]  }
  0x36   :  { %429 = vmatpush3.bf16.msra.mxu0 %v483_v1  ;;  %435 = vmatpush3.bf16.msra.mxu1 %v484_v3  ;;  %v489_v8 = vld [vmem:[#allocation7 + $0x10] sm:$0xff]   ;;  %v490_v9 = vld [vmem:[#allocation7 + $0x8] sm:$0xff]   ;;  %v491_v10 = vld [vmem:[#allocation7] sm:$0xff]  }
  0x37   :  { %454 = vmatprep.subr.bf16.mxu0 %v616_v0  ;;  %436 = vmatprep.subr.bf16.mxu1 %v616_v0  ;;  %v492_v11 = vld [vmem:[#allocation8 + $0x38] sm:$0xff]   ;;  %v493_v12 = vld [vmem:[#allocation8 + $0x30] sm:$0xff]   ;;  %v494_v13 = vld [vmem:[#allocation8 + $0x28] sm:$0xff]  }
  0x38   :  { %v495_v14 = vld [vmem:[#allocation8 + $0x20] sm:$0xff]   ;;  %v496_v15 = vld [vmem:[#allocation8 + $0x18] sm:$0xff]   ;;  %v497_v16 = vld [vmem:[#allocation8 + $0x10] sm:$0xff]  }
  0x39   :  { %431 = vmatmul.mubr.msk.bf16.vlgmr.msra.gmra.mxu0 %vm97_vm1, %v81_v2  ;;  %v387_v17 = vld [vmem:[%s714_s2] ss:$0 sm:$0xff]  ;;  %v498_v25 = vld [vmem:[#allocation8 + $0x8] sm:$0xff]   ;;  %v499_v26 = vld [vmem:[#allocation8] sm:$0xff]  }
  0x3a   :  { %470 = vmatprep.mubr.msk.bf16.mxu0 %vm617_vm0, %v616_v0  ;;  %437 = vmatpush3.bf16.msra.mxu1 %v485_v4  ;;  %v390_v27 = vld [vmem:[%s716_s4] ss:$0 sm:$0xff]  ;;  %s376_s4 = sshll.u32 %s618_s24, 4  ;;  %s377_s4 = int_to_ptr.vmem [resolvable:$true] %s376_s4 }
  0x3b   :  { %438 = vmatprep.subr.bf16.mxu1 %v616_v0  ;;  %455 = vmatpush3.bf16.msra.mxu0 %v492_v11  ;;  %v399_v35 = vld [vmem:[%s718_s6] ss:$0 sm:$0xff]  ;;  %s582_s25 = scalar_lea.vmem %s377_s4, 128  ;;  %p587_p7 = scmp.lt.s32.totalorder %s377_s4, %s377_s4 }
  0x3c   :  { %456 = vmatprep.subr.bf16.mxu0 %v616_v0  ;;  %p583_p6 = scmp.ne.s32.totalorder %s377_s4, %s582_s25  ;;  %p588_p8 = scmp.lt.s32.totalorder %s582_s25, %s582_s25 }
  0x3e   :  { %439 = vmatpush3.bf16.msra.mxu1 %v486_v5  ;;  %p589_p9 = por %p588_p8, %p587_p7 }
  0x3f   :  { %440 = vmatprep.subr.bf16.mxu1 %v616_v0  ;;  %457 = vmatpush3.bf16.msra.mxu0 %v493_v12 }
  0x40   :  { %458 = vmatprep.subr.bf16.mxu0 %v616_v0  ;;  %p590_p10 = pnand %p589_p9, %p583_p6 }
  0x42   :  { %441 = vmatpush3.bf16.msra.mxu1 %v487_v6 }
  0x43   :  { %442 = vmatprep.subr.bf16.mxu1 %v616_v0  ;;  %459 = vmatpush3.bf16.msra.mxu0 %v494_v13 }
  0x44   :  { %460 = vmatprep.subr.bf16.mxu0 %v616_v0 }
  0x46   :  { %443 = vmatpush3.bf16.msra.mxu1 %v488_v7 }
  0x47   :  { %444 = vmatprep.subr.bf16.mxu1 %v616_v0  ;;  %461 = vmatpush3.bf16.msra.mxu0 %v495_v14 }
  0x48   :  { %462 = vmatprep.subr.bf16.mxu0 %v616_v0 }
  0x4a   :  { %445 = vmatpush3.bf16.msra.mxu1 %v489_v8 }
  0x4b   :  { %446 = vmatprep.subr.bf16.mxu1 %v616_v0  ;;  %463 = vmatpush3.bf16.msra.mxu0 %v496_v15 }
  0x4c   :  { %464 = vmatprep.subr.bf16.mxu0 %v616_v0 }
  0x4e   :  { %447 = vmatpush3.bf16.msra.mxu1 %v490_v9 }
  0x4f   :  { %448 = vmatprep.subr.bf16.mxu1 %v616_v0  ;;  %465 = vmatpush3.bf16.msra.mxu0 %v497_v16 }
  0x50   :  { %466 = vmatprep.subr.bf16.mxu0 %v616_v0 }
  0x52   :  { %449 = vmatpush3.bf16.msra.mxu1 %v491_v10 }
  0x53   :  { %467 = vmatpush3.bf16.msra.mxu0 %v498_v25 }
  0x54   :  { %468 = vmatprep.subr.bf16.mxu0 %v616_v0 }
  0x57   :  { %469 = vmatpush3.bf16.msra.mxu0 %v499_v26 }
  0xf9   :  { %v135_v18 = vpop.f32.mrf.mxu0 }
  0xfa   :  { %v136_v19 = vadd.f32 %v387_v17, %v135_v18 }
  0xfb   :  { %v432_v20 = vpop.f32.mrf.mxu0 }
  0xfc   :  { %v141_v21 = vmax.f32 %v136_v19, 0.0 }
  0xfd   :  { %v138_v22 = vpop.f32.mrf.mxu0 }
  0xfe   :  { %v142_v23 = vpack.c.bf16 %v141_v21, %v141_v21 }
  0xff   :  { %v433_v24 = vpop.f32.mrf.mxu0 }
 0x100   :  { %451 = vmatmul.mubr.bf16.vlgmr.msra.gmra.mxu1 %v142_v23 }
 0x1c0   :  { %v248_v28 = vpop.f32.mrf.mxu1 }
 0x1c1   :  { %v249_v29 = vadd.f32 %v390_v27, %v248_v28 }
 0x1c2   :  { %v452_v30 = vpop.f32.mrf.mxu1 }
 0x1c3   :  { %v254_v31 = vmax.f32 %v249_v29, 0.0 }
 0x1c4   :  { %v251_v32 = vpop.f32.mrf.mxu1 }
 0x1c5   :  { %v255_v33 = vpack.c.bf16 %v254_v31, %v254_v31 }
 0x1c6   :  { %v453_v34 = vpop.f32.mrf.mxu1 }
 0x1c7   :  { %471 = vmatmul.mubr.bf16.vlgmr.msra.gmra.mxu0 %v255_v33 }
 0x287   :  { %v361_v36 = vpop.f32.mrf.mxu0 }
 0x288   :  { %v362_v37 = vadd.f32 %v399_v35, %v361_v36 }
 0x289   :  { %v472_v38 = vpop.f32.mrf.mxu0 }
 0x28a   :  { %500 = vtanh.f32 %v362_v37 }
 0x28b   :  { %v364_v39 = vpop.f32.mrf.mxu0 }
 0x28d   :  { %v473_v40 = vpop.f32.mrf.mxu0 }
 0x297   :  { %v501_v41 = vpop.eup %500 }
 0x298   :  { %v368_v42 = vmul.f32 2.0, %v501_v41 }
 0x29a   :  { %369 = vst [vmem:[#allocation10] sm:$0xff] %v368_v42 }
 0x29b   :  { %593 = shalt.err (!%p590_p10)
}
 0x29c   :  { %379 = dma.vmem_to_hbm [thread:$0]  %s377_s4, 128, %s719_s7, [#allocation4]  }
 0x29d   :  { %608 = dma.done.wait [#allocation4], 128  }
 0x29e   :  { %609 = vsyncadd [#allocation4], 4294967168 }
 0x29f   :  { %383 = vsyncpa [#allocation3], 1 }
 0x2a0   :  { %384 = vsyncpa [#allocation6], 1 }
 0x2a1   :  { %385 = vsyncpa [#allocation9], 1 }
 0x2a2   :  { %386 = vsyncpa [#allocation4], 1 }

</bundles_post_ra>
